<compile_context>
chip_gen: v6e
topology: v6e:2x2x1
jax: 0.10.0
libtpu: 0.0.40
codegen_flags: <defaults>
</compile_context>

<pallas_src>
import math
import numpy as np

import jax
import jax.numpy as jnp
from jax.experimental import pallas as pl
from jax.experimental.pallas import tpu as pltpu


def _round_up(x, m):
    return ((x + m - 1) // m) * m


def _cdiv(a, b):
    return (a + b - 1) // b


def pe_kernel(p_ref, rep_ref, cosmask_ref, out_ref):
    """One tile of the packed positional encoding.

    p_ref:       (tile_rows, KDp)   packed input (k original rows per row)
    rep_ref:     (KDp, W)           block-diag replication * 2**(j//2), resident
    cosmask_ref: (1, W)             1.0 on cos columns, 0.0 on sin columns
    out_ref:     (tile_rows, W)
    """
    # Replication + frequency scaling on the (otherwise idle) MXU.
    arg = jnp.dot(p_ref[...], rep_ref[...],
                  precision=jax.lax.Precision.HIGHEST,
                  preferred_element_type=jnp.float32)       # (tile_rows, W)
    is_cos = cosmask_ref[...] != 0.0                         # (1, W) -> broadcast
    out_ref[...] = jnp.where(is_cos, jnp.cos(arg), jnp.sin(arg)).astype(out_ref.dtype)


def position_encoding(p, L, *, tile_rows_max=512, out_dtype=jnp.float32):
    """Pallas positional encoding.  p: (B, D) float.  Returns (B, 2*L*D)."""
    p = p.astype(jnp.float32)
    B, D = p.shape
    out_dim = 2 * L * D

    # Pack k batch rows per kernel row so the output lane width is a multiple
    # of 128 (dense vregs, unmasked stores, full-width DMA descriptors).
    k = 128 // math.gcd(out_dim, 128)
    W = k * out_dim                       # output lane width (multiple of 128)
    KD = k * D                            # packed input lane width
    KDp = max(KD, 8)                      # tiny-contraction guard for the MXU

    # ---- constants (host-side, exact powers of two) ------------------------
    freqs = (2.0 ** (np.arange(2 * L) // 2)).astype(np.float32)   # (2L,)
    rep = np.zeros((KDp, W), dtype=np.float32)
    for s in range(k):
        for j in range(2 * L):
            for d in range(D):
                rep[s * D + d, s * out_dim + j * D + d] = freqs[j]
    rep = jnp.asarray(rep)

    jcol = (np.arange(W) % out_dim) // D
    cos_mask = jnp.asarray(((jcol % 2) == 1).astype(np.float32).reshape(1, W))

    # ---- adaptive tiling under a VMEM working-set budget --------------------
    rows = _cdiv(B, k)                                    # packed rows needed
    rep_bytes = _round_up(KDp, 8) * W * 4
    mask_bytes = 8 * W * 4
    per_row_bytes = 2 * 4 * (_round_up(KDp, 128) + W)     # dbl-buffered in+out
    budget = 40 * 1024 * 1024                             # fits v7x 64 MiB VMEM
    cap = max(8, ((budget - 2 * (rep_bytes + mask_bytes)) // per_row_bytes) // 8 * 8)
    tmax = max(8, min(int(tile_rows_max), cap))

    num_tiles = _cdiv(rows, tmax)
    if num_tiles == 1 and rows >= 16:
        num_tiles = 2                                     # let megacore shard
    tile_rows = _round_up(_cdiv(rows, num_tiles), 8)
    num_tiles = _cdiv(rows, tile_rows)
    rows_pad = num_tiles * tile_rows
    B_pad = rows_pad * k

    if B_pad != B:
        p = jnp.pad(p, ((0, B_pad - B), (0, 0)))
    p_packed = p.reshape(rows_pad, KD)                    # free row-major reshape
    if KDp != KD:
        p_packed = jnp.pad(p_packed, ((0, 0), (0, KDp - KD)))

    in_block = tile_rows * _round_up(KDp, 128) * 4
    out_block = tile_rows * W * 4
    working = 2 * (in_block + out_block) + 2 * (rep_bytes + mask_bytes)
    vmem_limit = int(min(100 * 1024 * 1024,
                         max(32 * 1024 * 1024, working + 8 * 1024 * 1024)))

    out_packed = pl.pallas_call(
        pe_kernel,
        out_shape=jax.ShapeDtypeStruct((rows_pad, W), out_dtype),
        grid_spec=pltpu.PrefetchScalarGridSpec(
            num_scalar_prefetch=0,
            grid=(num_tiles,),
            in_specs=[
                pl.BlockSpec((tile_rows, KDp), lambda i: (i, 0)),
                pl.BlockSpec((KDp, W), lambda i: (0, 0)),   # VMEM-resident const
                pl.BlockSpec((1, W), lambda i: (0, 0)),     # VMEM-resident const
            ],
            out_specs=pl.BlockSpec((tile_rows, W), lambda i: (i, 0)),
        ),
        compiler_params=pltpu.CompilerParams(
            dimension_semantics=("parallel",),
            vmem_limit_bytes=vmem_limit,
        ),
        cost_estimate=pl.CostEstimate(
            flops=int(2 * rows_pad * KDp * W + 4 * rows_pad * W),
            transcendentals=int(2 * rows_pad * W),
            bytes_accessed=int(4 * (rows_pad * KDp + rows_pad * W + KDp * W + W)),
        ),
    )(p_packed, rep, cos_mask)

    out = out_packed.reshape(B_pad, out_dim)
    return out[:B] if B_pad != B else out


def position_encoding_ref(p, L):
    """Pure-JAX reference matching the PyTorch module exactly."""
    p = p.astype(jnp.float32)
    B, D = p.shape
    powers = 2.0 ** jnp.arange(L, dtype=jnp.float32)             # (L,)
    pe = p[..., None] * powers[None, None, :]                    # (B, D, L)
    pe_matrix = jnp.zeros((B, D, 2 * L), dtype=jnp.float32)
    pe_matrix = pe_matrix.at[..., 0::2].set(jnp.sin(pe))
    pe_matrix = pe_matrix.at[..., 1::2].set(jnp.cos(pe))
    return jnp.transpose(pe_matrix, (0, 2, 1)).reshape(B, -1)    # (B, 2*L*D)


if __name__ == "__main__":
    key = jax.random.PRNGKey(0)

    # Case 1: (B, D) = (16, 4), L = 4 -> out_dim = 32, k = 4, W = 128.
    B, D, L = 16, 4, 4
    p = jax.random.normal(key, (B, D), dtype=jnp.float32)
    out = jax.block_until_ready(position_encoding(p, L))
    ref = position_encoding_ref(p, L)
    assert out.shape == (B, 2 * L * D), out.shape
    assert jnp.allclose(out, ref, atol=2e-5, rtol=1e-5), "mismatch (case 1)"

    # Case 2: NeRF-style xyz (D=3, L=5), odd batch -> padding + k=64 packing.
    B2, D2, L2 = 19, 3, 5
    p2 = jax.random.normal(jax.random.PRNGKey(1), (B2, D2), dtype=jnp.float32)
    out2 = jax.block_until_ready(position_encoding(p2, L2))
    ref2 = position_encoding_ref(p2, L2)
    assert out2.shape == (B2, 2 * L2 * D2), out2.shape
    assert jnp.allclose(out2, ref2, atol=2e-5, rtol=1e-5), "mismatch (case 2)"

    # Case 3: NeRF-typical L=10 with normalized coords in [-1, 1] (true-cos
    # path accuracy at larger arguments; tolerance covers f32 range reduction).
    B3, D3, L3 = 37, 3, 10
    p3 = jax.random.uniform(jax.random.PRNGKey(2), (B3, D3),
                            minval=-1.0, maxval=1.0, dtype=jnp.float32)
    out3 = jax.block_until_ready(position_encoding(p3, L3))
    ref3 = position_encoding_ref(p3, L3)
    assert out3.shape == (B3, 2 * L3 * D3), out3.shape
    assert jnp.allclose(out3, ref3, atol=2e-4, rtol=1e-4), "mismatch (case 3)"

    print("KERNEL_OK")
</pallas_src>

<mosaic_0001>
module attributes {stable_mosaic.version = 11 : i64} {
  func.func @pe_kernel(%arg0: i32, %arg1: memref<8x16xf32, #tpu.memory_space<vmem>>, %arg2: memref<16x128xf32, #tpu.memory_space<vmem>>, %arg3: memref<1x128xf32, #tpu.memory_space<vmem>>, %arg4: memref<8x128xf32, #tpu.memory_space<vmem>>) attributes {dimension_semantics = [#tpu.dimension_semantics<parallel>], iteration_bounds = array<i64: 1>, scalar_prefetch = 0 : i64, scratch_operands = 0 : i64, tpu.core_type = #tpu.core_type<tc>, window_params = [{transform_indices = @transform_0, window_bounds = array<i64: 8, 16>}, {pipeline_mode = #tpu.pipeline_mode<synchronous>, transform_indices = @transform_1, window_bounds = array<i64: 16, 128>}, {pipeline_mode = #tpu.pipeline_mode<synchronous>, transform_indices = @transform_2, window_bounds = array<i64: 1, 128>}, {transform_indices = @transform_3, window_bounds = array<i64: 8, 128>}]} {
    %c0 = arith.constant 0 : index
    %c0_0 = arith.constant 0 : index
    %0 = vector.load %arg1[%c0, %c0_0] : memref<8x16xf32, #tpu.memory_space<vmem>>, vector<8x16xf32>
    %c0_1 = arith.constant 0 : index
    %c0_2 = arith.constant 0 : index
    %1 = vector.load %arg2[%c0_1, %c0_2] : memref<16x128xf32, #tpu.memory_space<vmem>>, vector<16x128xf32>
    %cst = arith.constant dense<0.000000e+00> : vector<8x128xf32>
    %2 = tpu.matmul %0, %1, %cst {dimension_numbers = #tpu.dot_dimension_numbers<[1], [0], [0], [1], [0, 0, 1, 1], [], []>, precision = #tpu.contract_precision<fp32>} : vector<8x16xf32>, vector<16x128xf32>, vector<8x128xf32> -> vector<8x128xf32>
    %c0_3 = arith.constant 0 : index
    %c0_4 = arith.constant 0 : index
    %3 = vector.load %arg3[%c0_3, %c0_4] : memref<1x128xf32, #tpu.memory_space<vmem>>, vector<1x128xf32>
    %cst_5 = arith.constant 0.000000e+00 : f32
    %4 = vector.broadcast %cst_5 : f32 to vector<1x128xf32>
    %5 = arith.cmpf one, %3, %4 : vector<1x128xf32>
    %6 = math.cos %2 : vector<8x128xf32>
    %7 = math.sin %2 : vector<8x128xf32>
    %8 = vector.shape_cast %5 : vector<1x128xi1> to vector<1x128xi1>
    %9 = vector.broadcast %8 : vector<1x128xi1> to vector<8x128xi1>
    %10 = arith.select %9, %6, %7 : vector<8x128xi1>, vector<8x128xf32>
    %c0_6 = arith.constant 0 : index
    %c0_7 = arith.constant 0 : index
    %11 = vector.load %arg4[%c0_6, %c0_7] : memref<8x128xf32, #tpu.memory_space<vmem>>, vector<8x128xf32>
    tpu.vector_store %arg4[%c0_6, %c0_7], %10 {strides = array<i32>} : memref<8x128xf32, #tpu.memory_space<vmem>>, vector<8x128xf32>,
    return
  }
  func.func @transform_0(%arg0: i32) -> (i32, i32) {
    %c0_i32 = arith.constant 0 : i32
    %c0_i32_0 = arith.constant 0 : i32
    return %arg0, %c0_i32 : i32, i32
  }
  func.func @transform_1(%arg0: i32) -> (i32, i32) {
    %c0_i32 = arith.constant 0 : i32
    %c0_i32_0 = arith.constant 0 : i32
    %c0_i32_1 = arith.constant 0 : i32
    return %c0_i32, %c0_i32_0 : i32, i32
  }
  func.func @transform_2(%arg0: i32) -> (i32, i32) {
    %c0_i32 = arith.constant 0 : i32
    %c0_i32_0 = arith.constant 0 : i32
    %c0_i32_1 = arith.constant 0 : i32
    return %c0_i32, %c0_i32_0 : i32, i32
  }
  func.func @transform_3(%arg0: i32) -> (i32, i32) {
    %c0_i32 = arith.constant 0 : i32
    %c0_i32_0 = arith.constant 0 : i32
    return %arg0, %c0_i32 : i32, i32
  }
}

</mosaic_0001>

<bundles_post_ra>
// kernel: tpu_custom_call.1
= control target key start
LH: loop header
LB: loop body
LE: loop exit
PB: predicated region body
PF: predicated region fallthrough
CT: control target
= control target key end

     0   :  { %8 = vsyncpa [#allocation3], 0  ;;  %s970_s0 = inlined_call_operand.hbm [shape: f32[8,16], index: 0, kind: input, shape index: {}]   ;;  %s971_s1 = inlined_call_operand.hbm [shape: f32[16,128], index: 1, kind: input, shape index: {}]   ;;  %s972_s2 = inlined_call_operand.vmem [shape: f32[1,128], index: 2, kind: input, shape index: {}]   ;;  %s973_s3 = inlined_call_operand.hbm [shape: f32[8,128], index: 3, kind: output, shape index: {}]  }
   0x1   :  { %9 = vsyncpa [#allocation6], 0 }
   0x2   :  { %10 = vsyncpa [#allocation4], 0  ;;  %s896_s12 = smov [#allocation2]   ;;  %s897_s14 = smov [#allocation5]  }
   0x3   :  { %s17_s13 = sshll.u32 %s896_s12, 4  ;;  %s26_s15 = sshll.u32 %s897_s14, 4  ;;  %s18_s13 = int_to_ptr.vmem [resolvable:$true] %s17_s13  ;;  %s27_s15 = int_to_ptr.vmem [resolvable:$true] %s26_s15 }
   0x4   :  { %s838_s16 = scalar_lea.vmem %s18_s13, 128  ;;  %p843_p1 = scmp.lt.s32.totalorder %s18_s13, %s18_s13 }
   0x5   :  { %p839_p0 = scmp.ne.s32.totalorder %s18_s13, %s838_s16  ;;  %p844_p2 = scmp.lt.s32.totalorder %s838_s16, %s838_s16 }
   0x7   :  { %p845_p3 = por %p844_p2, %p843_p1 }
   0x9   :  { %p846_p4 = pnand %p845_p3, %p839_p0 }
   0xb   :  { %849 = shalt.err (!%p846_p4)
}
   0xc   :  { %20 = dma.hbm_to_vmem [thread:$0]  %s970_s0, 128, %s18_s13, [#allocation3]  }
   0xd   :  { %s858_s19 = scalar_lea.vmem %s27_s15, 256  ;;  %p863_p6 = scmp.lt.s32.totalorder %s27_s15, %s27_s15 }
   0xe   :  { %p859_p5 = scmp.ne.s32.totalorder %s27_s15, %s858_s19  ;;  %p864_p7 = scmp.lt.s32.totalorder %s858_s19, %s858_s19 }
  0x10   :  { %p865_p8 = por %p864_p7, %p863_p6 }
  0x12   :  { %p866_p9 = pnand %p865_p8, %p859_p5 }
  0x14   :  { %869 = shalt.err (!%p866_p9)
}
  0x15   :  { %s898_s20 = smov 128   ;;  %s899_s21 = smov 8  }
  0x16   :  { %32 = dma.hbm_to_vmem [thread:$0]  %s971_s1, 256, %s27_s15, [#allocation6], %s898_s20, %s898_s20, %s899_s21  }
  0x17   :  { %890 = dma.done.wait [#allocation3], 128  }
  0x18   :  { %891 = vsyncadd [#allocation3], 4294967168 }
  0x19   :  { %892 = dma.done.wait [#allocation6], 256  }
  0x1a   :  { %893 = vsyncadd [#allocation6], 4294967040  ;;  %v900_v0 = vmov 0.0   ;;  %vm901_vm0 = vmmov 0   ;;  %vm44_vm1 = vcmask 130048   ;;  %v43_v1 = vld [vmem:[#allocation5 + $0x8] sm:$0xff] }
  0x1b   :  { %766 = vmatprep.subr.mxu0 %v900_v0  ;;  %773 = vmatprep.subr.mxu1 %v900_v0  ;;  %v42_v2 = vld [vmem:[#allocation5] sm:$0xff]  ;;  %v41_v3 = vld [vmem:[#allocation2] sm:$0xff]  ;;  %v77_v4 = vand.u32 4294901760, %v43_v1  ;;  %v902_v47 = vmov 683565275  }
  0x1c   :  { %770 = vmatprep.mubr.msk.f32.mxu0 %vm901_vm0, %v900_v0  ;;  %777 = vmatprep.mubr.msk.f32.mxu1 %vm901_vm0, %v900_v0  ;;  %v80_v5 = vand.u32 4294901760, %v42_v2  ;;  %v46_v6 = vsel %vm44_vm1, %v41_v3, 0  ;;  %v903_v49 = vmov 2475754826   ;;  %v904_v52 = vmov 2131351028  }
  0x1d   :  { %v115_v7 = vand.u32 4294901760, %v46_v6  ;;  %767 = vmatpush3.msra.mxu0 %v77_v4  ;;  %v155_v8 = vsub.f32 %v43_v1, %v77_v4  ;;  %v905_v55 = vmov 2102212464   ;;  %v906_v58 = vmov 920167782  }
  0x1e   :  { %v162_v9 = vsub.f32 %v42_v2, %v80_v5  ;;  %768 = vmatprep.subr.mxu0 %v900_v0  ;;  %v907_v61 = vmov 1326507024  }
  0x1f   :  { %v116_v10 = vsub.f32 %v46_v6, %v115_v7  ;;  %769 = vmatpush3.msra.mxu0 %v80_v5  ;;  %v156_v11 = vand.u32 4294901760, %v155_v8 }
  0x20   :  { %v163_v12 = vand.u32 4294901760, %v162_v9  ;;  %780 = vmatprep.subr.mxu0 %v900_v0 }
  0x21   :  { %v117_v13 = vand.u32 4294901760, %v116_v10  ;;  %v157_v14 = vsub.f32 %v155_v8, %v156_v11 }
  0x22   :  { %v164_v15 = vsub.f32 %v162_v9, %v163_v12 }
  0x23   :  { %v118_v16 = vsub.f32 %v116_v10, %v117_v13  ;;  %v158_v17 = vand.u32 4294901760, %v157_v14 }
  0x24   :  { %v165_v18 = vand.u32 4294901760, %v164_v15 }
  0x25   :  { %v119_v19 = vand.u32 4294901760, %v118_v16  ;;  %774 = vmatpush3.msra.mxu1 %v158_v17 }
  0x26   :  { %775 = vmatprep.subr.mxu1 %v900_v0 }
  0x27   :  { %771 = vmatmul.mubr.f32.vlgmr.msra.gmra.mxu0 %v119_v19  ;;  %776 = vmatpush3.msra.mxu1 %v165_v18 }
  0x28   :  { %781 = vmatpush3.msra.mxu0 %v155_v8  ;;  %778 = vmatmul.mubr.f32.vlgmr.msra.gmra.mxu1 %v115_v7 }
  0x29   :  { %782 = vmatprep.subr.mxu0 %v900_v0  ;;  %787 = vmatprep.subr.mxu1 %v900_v0 }
  0x2a   :  { %783 = vmatpush3.msra.mxu0 %v162_v9  ;;  %784 = vmatprep.mubr.msk.f32.mxu0 %vm901_vm0, %v900_v0 }
  0x2b   :  { %788 = vmatpush3.msra.mxu1 %v77_v4  ;;  %785 = vmatmul.mubr.f32.vlgmr.msra.gmra.mxu0 %v116_v10 }
  0x2c   :  { %789 = vmatprep.subr.mxu1 %v900_v0  ;;  %794 = vmatprep.subr.mxu0 %v900_v0 }
  0x2d   :  { %790 = vmatpush3.msra.mxu1 %v80_v5  ;;  %791 = vmatprep.mubr.msk.f32.mxu1 %vm901_vm0, %v900_v0 }
  0x2e   :  { %795 = vmatpush3.msra.mxu0 %v156_v11  ;;  %792 = vmatmul.mubr.f32.vlgmr.msra.gmra.mxu1 %v117_v13 }
  0x2f   :  { %796 = vmatprep.subr.mxu0 %v900_v0  ;;  %801 = vmatprep.subr.mxu1 %v900_v0 }
  0x30   :  { %797 = vmatpush3.msra.mxu0 %v163_v12  ;;  %798 = vmatprep.mubr.msk.f32.mxu0 %vm901_vm0, %v900_v0 }
  0x31   :  { %802 = vmatpush3.msra.mxu1 %v77_v4  ;;  %799 = vmatmul.mubr.f32.vlgmr.msra.gmra.mxu0 %v115_v7 }
  0x32   :  { %803 = vmatprep.subr.mxu1 %v900_v0  ;;  %805 = vmatprep.mubr.msk.f32.mxu1 %vm901_vm0, %v900_v0 }
  0x33   :  { %804 = vmatpush3.msra.mxu1 %v80_v5 }
  0x34   :  { %806 = vmatmul.mubr.f32.vlgmr.msra.gmra.mxu1 %v115_v7 }
  0xe7   :  { %v121_v20 = vpop.f32.mrf.mxu0 }
  0xe8   :  { %v202_v22 = vpop.f32.mrf.mxu1 }
  0xe9   :  { %v772_v21 = vpop.f32.mrf.mxu0  ;;  %v203_v23 = vadd.f32 %v202_v22, %v121_v20 }
  0xea   :  { %v779_v24 = vpop.f32.mrf.mxu1 }
  0xeb   :  { %v278_v25 = vpop.f32.mrf.mxu0 }
  0xec   :  { %v279_v26 = vadd.f32 %v278_v25, %v203_v23 }
  0xed   :  { %v786_v27 = vpop.f32.mrf.mxu0 }
  0xee   :  { %v353_v28 = vpop.f32.mrf.mxu1 }
  0xef   :  { %v354_v29 = vadd.f32 %v353_v28, %v279_v26 }
  0xf0   :  { %v793_v30 = vpop.f32.mrf.mxu1 }
  0xf1   :  { %v430_v31 = vpop.f32.mrf.mxu0 }
  0xf2   :  { %v431_v32 = vadd.f32 %v430_v31, %v354_v29 }
  0xf3   :  { %v800_v33 = vpop.f32.mrf.mxu0 }
  0xf4   :  { %v503_v34 = vpop.f32.mrf.mxu1 }
  0xf5   :  { %v942_v35 = vadd.f32 %v503_v34, %v431_v32 }
  0xf6   :  { %v807_v36 = vpop.f32.mrf.mxu1 }
  0xf7   :  { %v512_v37 = vand.u32 2139095040, %v942_v35  ;;  %v509_v41 = vand.u32 2147483647, %v942_v35  ;;  %vm511_vm9 = vcmp.lt.s32.totalorder %v942_v35, 0 }
  0xf9   :  { %v513_v38 = vshrl.u32 %v512_v37, 23  ;;  %v516_v44 = vand.u32 8388607, %v509_v41  ;;  %vm510_vm10 = vcmp.le.f32.partialorder %v509_v41, 0.7853982 }
  0xfb   :  { %v740_v39 = vadd.s32 4294967169, %v513_v38  ;;  %v517_v63 = vor.u32 8388608, %v516_v44 }
  0xfd   :  { %v519_v40 = vadd.s32 1, %v740_v39  ;;  %v557_v13 = vshll.u32 %v517_v63, 8 }
  0xff   :  { %vm520_vm2 = vcmp.gt.s32.totalorder %v519_v40, 0 }
 0x100   :  { %v521_v42 = vsel %vm520_vm2, %v519_v40, 0 }
 0x101   :  { %v523_v43 = vand.u32 31, %v521_v42  ;;  %v522_v46 = vshrl.u32 %v521_v42, 5 }
 0x103   :  { %v524_v45 = vsub.s32 32, %v523_v43  ;;  %v526_v48 = vshll.u32 %v902_v47, %v523_v43  ;;  %v529_v50 = vshll.u32 %v903_v49, %v523_v43  ;;  %v532_v54 = vshll.u32 %v904_v52, %v523_v43 }
 0x104   :  { %v535_v57 = vshll.u32 %v905_v55, %v523_v43  ;;  %v538_v60 = vshll.u32 %v906_v58, %v523_v43  ;;  %vm541_vm3 = vcmp.lt.s32.totalorder %v522_v46, 1  ;;  %vm544_vm4 = vcmp.lt.s32.totalorder %v522_v46, 4 }
 0x105   :  { %v527_v51 = vshrl.u32 %v903_v49, %v524_v45  ;;  %v530_v53 = vshrl.u32 %v904_v52, %v524_v45  ;;  %v533_v56 = vshrl.u32 %v905_v55, %v524_v45  ;;  %v536_v59 = vshrl.u32 %v906_v58, %v524_v45 }
 0x106   :  { %v539_v62 = vshrl.u32 %v907_v61, %v524_v45  ;;  %v525_v8 = vshrl.u32 %v902_v47, %v524_v45  ;;  %vm543_vm5 = vcmp.lt.s32.totalorder %v522_v46, 3  ;;  %vm542_vm6 = vcmp.lt.s32.totalorder %v522_v46, 2 }
 0x107   :  { %v528_v0 = vor.u32 %v527_v51, %v526_v48  ;;  %v531_v1 = vor.u32 %v530_v53, %v529_v50  ;;  %v534_v2 = vor.u32 %v533_v56, %v532_v54  ;;  %v537_v3 = vor.u32 %v536_v59, %v535_v57  ;;  %v507_v56 = vld [vmem:[%s972_s2] sm:$0x1]  ;;  %s909_s2 = smov [#allocation7]  }
 0x108   :  { %v540_v4 = vor.u32 %v539_v62, %v538_v60  ;;  %v717_v54 = vlaneseq  ;;  %vm508_vm11 = vcmp.ne.f32.partialorder %v507_v56, 0.0  ;;  %v908_v61 = vmov 0   ;;  %s730_s24 = sshll.u32 %s909_s2, 4  ;;  %s731_s24 = int_to_ptr.vmem [resolvable:$true] %s730_s24 }
 0x109   :  { %v546_v5 = vsel %vm544_vm4, %v534_v2, 2102212464  ;;  %v549_v6 = vsel %vm541_vm3, %v528_v0, %v531_v1  ;;  %v553_v7 = vsel %vm541_vm3, %v531_v1, %v534_v2  ;;  %v550_v9 = vsel %vm544_vm4, %v537_v3, 920167782  ;;  %s870_s25 = scalar_lea.vmem %s731_s24, 128  ;;  %p875_p11 = scmp.lt.s32.totalorder %s731_s24, %s731_s24 }
 0x10a   :  { %v554_v10 = vsel %vm544_vm4, %v540_v4, 1326507024  ;;  %v551_v11 = vsel %vm543_vm5, %v534_v2, %v550_v9  ;;  %v545_v14 = vsel %vm541_vm3, %v525_v8, %v528_v0  ;;  %v547_v15 = vsel %vm543_vm5, %v531_v1, %v546_v5  ;;  %p871_p10 = scmp.ne.s32.totalorder %s731_s24, %s870_s25  ;;  %p876_p12 = scmp.lt.s32.totalorder %s870_s25, %s870_s25 }
 0x10b   :  { %v555_v12 = vsel %vm543_vm5, %v537_v3, %v554_v10  ;;  %v552_v16 = vsel %vm542_vm6, %v549_v6, %v551_v11  ;;  %v548_v22 = vsel %vm542_vm6, %v545_v14, %v547_v15  ;;  %v718_v57 = vshrl.u32 %v717_v54, 7 }
 0x10c   :  { %v556_v17 = vsel %vm542_vm6, %v553_v7, %v555_v12  ;;  %v951_v20 = vmul.u32.u64.low %v557_v13, %v552_v16  ;;  %v952_v21 = vmul.u32.u64.high %v557_v13, %v552_v16, %v951_v20  ;;  %v564_v24 = vmul.u32 %v557_v13, %v548_v22  ;;  %p877_p13 = por %p876_p12, %p875_p11 }
 0x10d   :  { %v948_v18 = vmul.u32.u64.low %v557_v13, %v556_v17  ;;  %v949_v19 = vmul.u32.u64.high %v557_v13, %v556_v17, %v948_v18  ;;  %v719_v60 = vsub.s32 0, %v718_v57  ;;  %v716_v62 = vsel %vm508_vm11, 1, %v908_v61 }
 0x10e   :  { %v567_v23 = vadd.s32 1, %v952_v21  ;;  %vm601_vm3 = vweird.f32 %v942_v35  ;;  %p878_p0 = pnand %p877_p13, %p871_p10 }
 0x10f   :  { %vm566_vm7 = vc.u32 %v949_v19, %v951_v20  ;;  %v565_v37 = vadd.s32 %v951_v20, %v949_v19  ;;  %v720_v0 = vrot.slane %v716_v62, %v719_v60 }
 0x110   :  { %v568_v25 = vsel %vm566_vm7, %v567_v23, %v952_v21 }
 0x111   :  { %v569_v26 = vadd.s32 %v568_v25, %v564_v24  ;;  %vm721_vm14 = vcmp.eq.s32.totalorder %v720_v0, 1 }
 0x113   :  { %v570_v27 = vadd.s32 536870912, %v569_v26 }
 0x115   :  { %v571_v28 = vshrl.u32 %v570_v27, 30 }
 0x117   :  { %v572_v29 = vshll.u32 %v571_v28, 30  ;;  %v595_v51 = vsub.s32 4, %v571_v28 }
 0x119   :  { %v573_v30 = vsub.s32 %v569_v26, %v572_v29  ;;  %v596_v55 = vsel %vm511_vm9, %v595_v51, %v571_v28 }
 0x11a   :  { %v598_v58 = vsel %vm510_vm10, 0, %v596_v55 }
 0x11b   :  { %v575_v31 = vsub.s32 0, %v573_v30  ;;  %v705_v59 = vadd.s32 3, %v598_v58  ;;  %v602_v63 = vand.u32 3, %v598_v58 }
 0x11d   :  { %v741_v32 = vmin.u32 %v575_v31, %v573_v30  ;;  %v706_v41 = vand.u32 3, %v705_v59  ;;  %vm607_vm12 = vcmp.eq.s32.totalorder %v602_v63, 2  ;;  %vm604_vm15 = vcmp.eq.s32.totalorder %v602_v63, 0 }
 0x11e   :  { %vm603_vm1 = vcmp.lt.s32.totalorder %v602_v63, 2 }
 0x11f   :  { %v577_v33 = vclz %v741_v32  ;;  %vm711_vm13 = vcmp.eq.s32.totalorder %v706_v41, 2  ;;  %vm708_vm0 = vcmp.eq.s32.totalorder %v706_v41, 0  ;;  %vm707_vm2 = vcmp.lt.s32.totalorder %v706_v41, 2 }
 0x121   :  { %v742_v34 = vadd.s32 4294967294, %v577_v33 }
 0x123   :  { %vm743_vm8 = vcmp.lt.s32.totalorder %v742_v34, 0 }
 0x124   :  { %v580_v36 = vsel %vm743_vm8, 0, %v742_v34 }
 0x125   :  { %v581_v38 = vsub.s32 32, %v580_v36  ;;  %v585_v39 = vsub.s32 4294967266, %v580_v36  ;;  %v582_v40 = vshll.u32 %v573_v30, %v580_v36 }
 0x127   :  { %v583_v42 = vshrl.u32 %v565_v37, %v581_v38  ;;  %v586_v43 = vadd.s32 127, %v585_v39 }
 0x129   :  { %v584_v44 = vor.u32 %v583_v42, %v582_v40  ;;  %v587_v45 = vshll.u32 %v586_v43, 23 }
 0x12b   :  { %v588_v46 = vor.u32 4788187, %v587_v45  ;;  %v591_v48 = vcvt.s32.f32 %v584_v44 }
 0x12d   :  { %v589_v47 = vand.u32 2147483647, %v588_v46 }
 0x12f   :  { %v592_v49 = vmul.f32 %v591_v48, %v589_v47 }
 0x131   :  { %v593_v50 = vxor.u32 2147483648, %v592_v49 }
 0x133   :  { %v594_v52 = vsel %vm511_vm9, %v593_v50, %v592_v49 }
 0x134   :  { %v597_v53 = vsel %vm510_vm10, %v942_v35, %v594_v52 }
 0x135   :  { %826 = vcosq.f32 %v597_v53 }
 0x136   :  { %828 = vsinq.f32 %v597_v53 }
 0x142   :  { %v827_v1 = vpop.eup %826 }
 0x143   :  { %v829_v2 = vpop.eup %828  ;;  %v608_v3 = vxor.u32 2147483648, %v827_v1 }
 0x144   :  { %v605_v4 = vxor.u32 2147483648, %v829_v2 }
 0x145   :  { %v609_v5 = vsel %vm607_vm12, %v608_v3, %v829_v2  ;;  %v713_v6 = vsel %vm711_vm13, %v608_v3, %v829_v2 }
 0x146   :  { %v606_v7 = vsel %vm604_vm15, %v827_v1, %v605_v4  ;;  %v710_v8 = vsel %vm708_vm0, %v827_v1, %v605_v4 }
 0x147   :  { %v610_v9 = vsel %vm603_vm1, %v606_v7, %v609_v5  ;;  %v714_v10 = vsel %vm707_vm2, %v710_v8, %v713_v6 }
 0x148   :  { %v611_v11 = vsel %vm601_vm3, nan, %v610_v9  ;;  %v715_v12 = vsel %vm601_vm3, nan, %v714_v10 }
 0x149   :  { %v722_v13 = vsel %vm721_vm14, %v611_v11, %v715_v12 }
 0x14a   :  { %723 = vst [vmem:[#allocation7] sm:$0xff] %v722_v13 }
 0x14b   :  { %881 = shalt.err (!%p878_p0)
}
 0x14c   :  { %733 = dma.vmem_to_hbm [thread:$0]  %s731_s24, 128, %s973_s3, [#allocation4]  }
 0x14d   :  { %894 = dma.done.wait [#allocation4], 128  }
 0x14e   :  { %895 = vsyncadd [#allocation4], 4294967168 }
 0x14f   :  { %737 = vsyncpa [#allocation3], 1 }
 0x150   :  { %738 = vsyncpa [#allocation6], 1 }
 0x151   :  { %739 = vsyncpa [#allocation4], 1 }

</bundles_post_ra>
